<compile_context>
chip_gen: v6e
topology: v6e:2x2x1
jax: 0.10.0
libtpu: 0.0.40
codegen_flags: <defaults>
</compile_context>

<pallas_src>
import math

import jax
import jax.numpy as jnp
from jax.experimental import pallas as pl
from jax.experimental.pallas import tpu as pltpu


def _round_up(n, m):
    return ((n + m - 1) // m) * m


def _mlp_head_kernel(
    nvalid_ref,                                   # SMEM scalar prefetch: (1,) i32
    x_ref,                                        # (ndim_x, TB) f32
    w1_ref, b1_ref, w2_ref, b2_ref, w3_ref, b3_ref,
    w4_ref, b4_ref, w5_ref, b5_ref, wh_ref, bh_ref,
    y_ref,                                        # (nc+1, TB) f32 raw head output
    pmax_ref, psum_ref,                           # (nc+1, 128) f32 softmax partials
):
    """MLP trunk + fused head matmul + per-tile batch-axis softmax partials."""

    def layer(h, w_ref, b_ref):
        # (out, in) bf16 @ (in, TB) bf16 -> f32 accumulate; bias/ReLU in f32.
        z = jnp.dot(w_ref[...], h.astype(jnp.bfloat16),
                    preferred_element_type=jnp.float32) + b_ref[...]
        return jnp.maximum(z, 0.0)

    h = x_ref[...]                                # (ndim_x, TB) f32
    h = layer(h, w1_ref, b1_ref)                  # (16,  TB)
    h = layer(h, w2_ref, b2_ref)                  # (32,  TB)
    h = layer(h, w3_ref, b3_ref)                  # (64,  TB)
    h = layer(h, w4_ref, b4_ref)                  # (128, TB)
    h = layer(h, w5_ref, b5_ref)                  # (128, TB)

    # Fused head: one MXU push producing softmax logits (rows 0..nc-1) and the
    # softplus pre-activation (row nc) as one lane-dense slab.
    y = jnp.dot(wh_ref[...], h.astype(jnp.bfloat16),
                preferred_element_type=jnp.float32) + bh_ref[...]   # (nc+1, TB)
    y_ref[...] = y

    # Per-tile softmax partials over the batch (lane) axis; mask padded columns
    # with a single (1, TB) row mask (cheap VPU work).
    tb = y_ref.shape[1]
    col0 = pl.program_id(0) * tb
    cols = col0 + jax.lax.broadcasted_iota(jnp.int32, (1, tb), 1)
    valid = cols < nvalid_ref[0]

    y_masked = jnp.where(valid, y, -1e30)
    tile_max = jnp.max(y_masked, axis=1, keepdims=True)              # (nc+1, 1)
    # min-clamp keeps padded-column exps finite; valid columns are <= tile_max.
    e = jnp.where(valid, jnp.exp(jnp.minimum(y - tile_max, 0.0)), 0.0)
    tile_sum = jnp.sum(e, axis=1, keepdims=True)                     # (nc+1, 1)

    # Partials are written as lane-dense (nc+1, 128) blocks: tile_max broadcast
    # over all lanes (max-combine unaffected), tile_sum on lane 0 with zeros
    # elsewhere (sum-combine unaffected).
    lane = jax.lax.broadcasted_iota(jnp.int32, pmax_ref.shape, 1)
    pmax_ref[...] = jnp.broadcast_to(tile_max, pmax_ref.shape)
    psum_ref[...] = jnp.where(lane == 0, tile_sum, 0.0)


def estimator_infer_sigma_forward(x, params, *, block_cols=4096):
    """x: (B, ndim_x) f32. params: 7 (W, b) pairs, W is (in, out), b is (1, out).

    block_cols: batch-tile width (lane axis). 4096 is VMEM-safe on v5e/v6e/v7x;
    pick it so nb >= 2 on v7x if the batch is large enough (megacore).
    """
    batch, ndim_x = x.shape
    n_centers = params[5][0].shape[1]
    nc1 = n_centers + 1

    tb = min(block_cols, _round_up(batch, 128))
    b_pad = _round_up(batch, tb)
    nb = b_pad // tb

    # Batch rides the lane axis: transpose x once in the wrapper.
    xT = x.T                                                        # (ndim_x, B)
    if b_pad != batch:
        xT = jnp.pad(xT, ((0, 0), (0, b_pad - batch)))

    # Fused head + transposed weights (out, in) in bf16; biases as f32 columns.
    w_head = jnp.concatenate([params[5][0], params[6][0]], axis=1)  # (128, nc+1)
    b_head = jnp.concatenate([params[5][1], params[6][1]], axis=1)  # (1, nc+1)
    weights = [params[i][0].T.astype(jnp.bfloat16) for i in range(5)]
    weights.append(w_head.T.astype(jnp.bfloat16))                   # (nc+1, 128)
    biases = [params[i][1].T.astype(jnp.float32) for i in range(5)] # (out, 1)
    biases.append(b_head.T.astype(jnp.float32))                     # (nc+1, 1)

    flat_inputs = [xT]
    in_specs = [pl.BlockSpec((ndim_x, tb), lambda b, nv: (0, b))]
    for w, bvec in zip(weights, biases):
        flat_inputs.extend([w, bvec])
        in_specs.append(pl.BlockSpec(w.shape, lambda b, nv: (0, 0)))     # VMEM-resident
        in_specs.append(pl.BlockSpec(bvec.shape, lambda b, nv: (0, 0)))

    nvalid = jnp.array([batch], dtype=jnp.int32)   # scalar-prefetch (SMEM)

    grid_spec = pltpu.PrefetchScalarGridSpec(
        num_scalar_prefetch=1,
        grid=(nb,),
        in_specs=in_specs,
        out_specs=(
            pl.BlockSpec((nc1, tb), lambda b, nv: (0, b)),
            pl.BlockSpec((nc1, 128), lambda b, nv: (0, b)),
            pl.BlockSpec((nc1, 128), lambda b, nv: (0, b)),
        ),
    )

    y_raw, pmax, psum = pl.pallas_call(
        _mlp_head_kernel,
        grid_spec=grid_spec,
        out_shape=(
            jax.ShapeDtypeStruct((nc1, b_pad), jnp.float32),
            jax.ShapeDtypeStruct((nc1, nb * 128), jnp.float32),
            jax.ShapeDtypeStruct((nc1, nb * 128), jnp.float32),
        ),
        compiler_params=pltpu.CompilerParams(
            dimension_semantics=("parallel",),
            vmem_limit_bytes=32 * 1024 * 1024,
        ),
    )(nvalid, *flat_inputs)

    # Tiny cross-tile softmax combine + finalize in plain JAX (fused by XLA):
    # exact division (no approx reciprocal), and the layout transpose back.
    gmax = jnp.max(pmax, axis=1, keepdims=True)                          # (nc+1, 1)
    denom = jnp.sum(psum * jnp.exp(pmax - gmax), axis=1, keepdims=True)  # (nc+1, 1)
    yT = y_raw[:, :batch]                                                # (nc+1, B)
    softmax = jnp.exp(yT - gmax) / denom
    softplus = jnp.where(yT > 20.0, yT,
                         jnp.log1p(jnp.exp(jnp.minimum(yT, 20.0))))      # PyTorch Softplus
    is_softmax_row = (jnp.arange(nc1) < n_centers)[:, None]
    outT = jnp.where(is_softmax_row, softmax, softplus)                  # (nc+1, B)
    return outT.T                                                        # (B, nc+1)


def _init_linear(key, in_dim, out_dim):
    # Deterministic init mirroring nn.Linear's uniform(-1/sqrt(in), 1/sqrt(in)).
    k_w, k_b = jax.random.split(key)
    bound = 1.0 / math.sqrt(in_dim)
    w = jax.random.uniform(k_w, (in_dim, out_dim), jnp.float32, -bound, bound)
    b = jax.random.uniform(k_b, (1, out_dim), jnp.float32, -bound, bound)
    return w, b


def make_params(key, ndim_x, n_centers):
    # TODO(synk): linear_7 is declared as Linear(32, 1) in the PyTorch __init__
    # but the forward applies it to the 128-dim output of linear_5 (shape error
    # in PyTorch); implemented here as Linear(128, 1) so the forward is runnable.
    dims = [
        (ndim_x, 16),      # linear_1
        (16, 32),          # linear_2
        (32, 64),          # linear_3
        (64, 128),         # linear_4
        (128, 128),        # linear_5
        (128, n_centers),  # linear_6
        (128, 1),          # linear_7 (see note above)
    ]
    keys = jax.random.split(key, len(dims))
    return [_init_linear(k, i, o) for k, (i, o) in zip(keys, dims)]


def _reference_forward(x, params):
    # Precision-matched reference: bf16 matmul operands, f32 accumulation,
    # f32 elementwise math — same numerics as the kernel's MXU path.
    def dot_bf16(a, w):
        return jnp.dot(a.astype(jnp.bfloat16), w.astype(jnp.bfloat16),
                       preferred_element_type=jnp.float32)

    h = x
    for w, b in params[:5]:
        h = jnp.maximum(dot_bf16(h, w) + b, 0.0)
    logits = dot_bf16(h, params[5][0]) + params[5][1]
    out1 = jax.nn.softmax(logits, axis=0)                # softmax over dim 0 (batch)
    z = dot_bf16(h, params[6][0]) + params[6][1]
    out2 = jnp.where(z > 20.0, z, jnp.log1p(jnp.exp(z)))
    return jnp.concatenate([out1, out2], axis=1)


if __name__ == "__main__":
    ndim_x, n_centers = 4, 8

    root = jax.random.PRNGKey(0)
    k_x, k_p = jax.random.split(root)
    params = make_params(k_p, ndim_x, n_centers)

    # Case 1: tiny batch, single tile (default block_cols).
    x_small = jax.random.normal(k_x, (8, ndim_x), jnp.float32)
    out_small = jax.block_until_ready(estimator_infer_sigma_forward(x_small, params))
    ref_small = _reference_forward(x_small, params)
    assert out_small.shape == (8, n_centers + 1)
    assert jnp.allclose(out_small, ref_small, atol=5e-4, rtol=5e-3), \
        "mismatch vs JAX reference (small batch)"

    # Case 2: multi-tile batch with padding — exercises the cross-tile
    # batch-axis softmax combine, the last-tile validity mask, and nb >= 2.
    x_big = jax.random.normal(k_x, (200, ndim_x), jnp.float32)
    out_big = jax.block_until_ready(
        estimator_infer_sigma_forward(x_big, params, block_cols=128))
    ref_big = _reference_forward(x_big, params)
    assert out_big.shape == (200, n_centers + 1)
    assert jnp.allclose(out_big, ref_big, atol=5e-4, rtol=5e-3), \
        "mismatch vs JAX reference (multi-tile batch)"

    print("KERNEL_OK")
</pallas_src>

<mosaic_0001>
module attributes {stable_mosaic.version = 11 : i64} {
  func.func @_mlp_head_kernel(%arg0: i32, %arg1: memref<1xi32, #tpu.memory_space<smem>>, %arg2: memref<4x128xf32, #tpu.memory_space<vmem>>, %arg3: memref<16x4xbf16, #tpu.memory_space<vmem>>, %arg4: memref<16x1xf32, #tpu.memory_space<vmem>>, %arg5: memref<32x16xbf16, #tpu.memory_space<vmem>>, %arg6: memref<32x1xf32, #tpu.memory_space<vmem>>, %arg7: memref<64x32xbf16, #tpu.memory_space<vmem>>, %arg8: memref<64x1xf32, #tpu.memory_space<vmem>>, %arg9: memref<128x64xbf16, #tpu.memory_space<vmem>>, %arg10: memref<128x1xf32, #tpu.memory_space<vmem>>, %arg11: memref<128x128xbf16, #tpu.memory_space<vmem>>, %arg12: memref<128x1xf32, #tpu.memory_space<vmem>>, %arg13: memref<9x128xbf16, #tpu.memory_space<vmem>>, %arg14: memref<9x1xf32, #tpu.memory_space<vmem>>, %arg15: memref<9x128xf32, #tpu.memory_space<vmem>>, %arg16: memref<9x128xf32, #tpu.memory_space<vmem>>, %arg17: memref<9x128xf32, #tpu.memory_space<vmem>>) attributes {dimension_semantics = [#tpu.dimension_semantics<parallel>], iteration_bounds = array<i64: 1>, scalar_prefetch = 1 : i64, scratch_operands = 0 : i64, tpu.core_type = #tpu.core_type<tc>, window_params = [{transform_indices = @transform_0, window_bounds = array<i64: 4, 128>}, {pipeline_mode = #tpu.pipeline_mode<synchronous>, transform_indices = @transform_1, window_bounds = array<i64: 16, 4>}, {pipeline_mode = #tpu.pipeline_mode<synchronous>, transform_indices = @transform_2, window_bounds = array<i64: 16, 1>}, {pipeline_mode = #tpu.pipeline_mode<synchronous>, transform_indices = @transform_3, window_bounds = array<i64: 32, 16>}, {pipeline_mode = #tpu.pipeline_mode<synchronous>, transform_indices = @transform_4, window_bounds = array<i64: 32, 1>}, {pipeline_mode = #tpu.pipeline_mode<synchronous>, transform_indices = @transform_5, window_bounds = array<i64: 64, 32>}, {pipeline_mode = #tpu.pipeline_mode<synchronous>, transform_indices = @transform_6, window_bounds = array<i64: 64, 1>}, {pipeline_mode = #tpu.pipeline_mode<synchronous>, transform_indices = @transform_7, window_bounds = array<i64: 128, 64>}, {pipeline_mode = #tpu.pipeline_mode<synchronous>, transform_indices = @transform_8, window_bounds = array<i64: 128, 1>}, {pipeline_mode = #tpu.pipeline_mode<synchronous>, transform_indices = @transform_9, window_bounds = array<i64: 128, 128>}, {pipeline_mode = #tpu.pipeline_mode<synchronous>, transform_indices = @transform_10, window_bounds = array<i64: 128, 1>}, {pipeline_mode = #tpu.pipeline_mode<synchronous>, transform_indices = @transform_11, window_bounds = array<i64: 9, 128>}, {pipeline_mode = #tpu.pipeline_mode<synchronous>, transform_indices = @transform_12, window_bounds = array<i64: 9, 1>}, {transform_indices = @transform_13, window_bounds = array<i64: 9, 128>}, {transform_indices = @transform_14, window_bounds = array<i64: 9, 128>}, {transform_indices = @transform_15, window_bounds = array<i64: 9, 128>}]} {
    %c0 = arith.constant 0 : index
    %c0_0 = arith.constant 0 : index
    %0 = vector.load %arg2[%c0, %c0_0] : memref<4x128xf32, #tpu.memory_space<vmem>>, vector<4x128xf32>
    %c0_1 = arith.constant 0 : index
    %c0_2 = arith.constant 0 : index
    %1 = vector.load %arg3[%c0_1, %c0_2] : memref<16x4xbf16, #tpu.memory_space<vmem>>, vector<16x4xbf16>
    %2 = arith.truncf %0 : vector<4x128xf32> to vector<4x128xbf16>
    %cst = arith.constant dense<0.000000e+00> : vector<16x128xf32>
    %3 = tpu.matmul %1, %2, %cst {dimension_numbers = #tpu.dot_dimension_numbers<[1], [0], [0], [1], [0, 0, 1, 1], [], []>} : vector<16x4xbf16>, vector<4x128xbf16>, vector<16x128xf32> -> vector<16x128xf32>
    %c0_3 = arith.constant 0 : index
    %c0_4 = arith.constant 0 : index
    %4 = vector.load %arg4[%c0_3, %c0_4] : memref<16x1xf32, #tpu.memory_space<vmem>>, vector<16x1xf32>
    %5 = vector.broadcast %4 : vector<16x1xf32> to vector<16x128xf32>
    %6 = arith.addf %3, %5 : vector<16x128xf32>
    %cst_5 = arith.constant 0.000000e+00 : f32
    %7 = vector.broadcast %cst_5 : f32 to vector<16x128xf32>
    %8 = arith.maximumf %6, %7 : vector<16x128xf32>
    %c0_6 = arith.constant 0 : index
    %c0_7 = arith.constant 0 : index
    %9 = vector.load %arg5[%c0_6, %c0_7] : memref<32x16xbf16, #tpu.memory_space<vmem>>, vector<32x16xbf16>
    %10 = arith.truncf %8 : vector<16x128xf32> to vector<16x128xbf16>
    %cst_8 = arith.constant dense<0.000000e+00> : vector<32x128xf32>
    %11 = tpu.matmul %9, %10, %cst_8 {dimension_numbers = #tpu.dot_dimension_numbers<[1], [0], [0], [1], [0, 0, 1, 1], [], []>} : vector<32x16xbf16>, vector<16x128xbf16>, vector<32x128xf32> -> vector<32x128xf32>
    %c0_9 = arith.constant 0 : index
    %c0_10 = arith.constant 0 : index
    %12 = vector.load %arg6[%c0_9, %c0_10] : memref<32x1xf32, #tpu.memory_space<vmem>>, vector<32x1xf32>
    %13 = vector.broadcast %12 : vector<32x1xf32> to vector<32x128xf32>
    %14 = arith.addf %11, %13 : vector<32x128xf32>
    %cst_11 = arith.constant 0.000000e+00 : f32
    %15 = vector.broadcast %cst_11 : f32 to vector<32x128xf32>
    %16 = arith.maximumf %14, %15 : vector<32x128xf32>
    %c0_12 = arith.constant 0 : index
    %c0_13 = arith.constant 0 : index
    %17 = vector.load %arg7[%c0_12, %c0_13] : memref<64x32xbf16, #tpu.memory_space<vmem>>, vector<64x32xbf16>
    %18 = arith.truncf %16 : vector<32x128xf32> to vector<32x128xbf16>
    %cst_14 = arith.constant dense<0.000000e+00> : vector<64x128xf32>
    %19 = tpu.matmul %17, %18, %cst_14 {dimension_numbers = #tpu.dot_dimension_numbers<[1], [0], [0], [1], [0, 0, 1, 1], [], []>} : vector<64x32xbf16>, vector<32x128xbf16>, vector<64x128xf32> -> vector<64x128xf32>
    %c0_15 = arith.constant 0 : index
    %c0_16 = arith.constant 0 : index
    %20 = vector.load %arg8[%c0_15, %c0_16] : memref<64x1xf32, #tpu.memory_space<vmem>>, vector<64x1xf32>
    %21 = vector.broadcast %20 : vector<64x1xf32> to vector<64x128xf32>
    %22 = arith.addf %19, %21 : vector<64x128xf32>
    %cst_17 = arith.constant 0.000000e+00 : f32
    %23 = vector.broadcast %cst_17 : f32 to vector<64x128xf32>
    %24 = arith.maximumf %22, %23 : vector<64x128xf32>
    %c0_18 = arith.constant 0 : index
    %c0_19 = arith.constant 0 : index
    %25 = vector.load %arg9[%c0_18, %c0_19] : memref<128x64xbf16, #tpu.memory_space<vmem>>, vector<128x64xbf16>
    %26 = arith.truncf %24 : vector<64x128xf32> to vector<64x128xbf16>
    %cst_20 = arith.constant dense<0.000000e+00> : vector<128x128xf32>
    %27 = tpu.matmul %25, %26, %cst_20 {dimension_numbers = #tpu.dot_dimension_numbers<[1], [0], [0], [1], [0, 0, 1, 1], [], []>} : vector<128x64xbf16>, vector<64x128xbf16>, vector<128x128xf32> -> vector<128x128xf32>
    %c0_21 = arith.constant 0 : index
    %c0_22 = arith.constant 0 : index
    %28 = vector.load %arg10[%c0_21, %c0_22] : memref<128x1xf32, #tpu.memory_space<vmem>>, vector<128x1xf32>
    %29 = vector.broadcast %28 : vector<128x1xf32> to vector<128x128xf32>
    %30 = arith.addf %27, %29 : vector<128x128xf32>
    %cst_23 = arith.constant 0.000000e+00 : f32
    %31 = vector.broadcast %cst_23 : f32 to vector<128x128xf32>
    %32 = arith.maximumf %30, %31 : vector<128x128xf32>
    %c0_24 = arith.constant 0 : index
    %c0_25 = arith.constant 0 : index
    %33 = vector.load %arg11[%c0_24, %c0_25] : memref<128x128xbf16, #tpu.memory_space<vmem>>, vector<128x128xbf16>
    %34 = arith.truncf %32 : vector<128x128xf32> to vector<128x128xbf16>
    %cst_26 = arith.constant dense<0.000000e+00> : vector<128x128xf32>
    %35 = tpu.matmul %33, %34, %cst_26 {dimension_numbers = #tpu.dot_dimension_numbers<[1], [0], [0], [1], [0, 0, 1, 1], [], []>} : vector<128x128xbf16>, vector<128x128xbf16>, vector<128x128xf32> -> vector<128x128xf32>
    %c0_27 = arith.constant 0 : index
    %c0_28 = arith.constant 0 : index
    %36 = vector.load %arg12[%c0_27, %c0_28] : memref<128x1xf32, #tpu.memory_space<vmem>>, vector<128x1xf32>
    %37 = vector.broadcast %36 : vector<128x1xf32> to vector<128x128xf32>
    %38 = arith.addf %35, %37 : vector<128x128xf32>
    %cst_29 = arith.constant 0.000000e+00 : f32
    %39 = vector.broadcast %cst_29 : f32 to vector<128x128xf32>
    %40 = arith.maximumf %38, %39 : vector<128x128xf32>
    %c0_30 = arith.constant 0 : index
    %c0_31 = arith.constant 0 : index
    %41 = vector.load %arg13[%c0_30, %c0_31] : memref<9x128xbf16, #tpu.memory_space<vmem>>, vector<9x128xbf16>
    %42 = arith.truncf %40 : vector<128x128xf32> to vector<128x128xbf16>
    %cst_32 = arith.constant dense<0.000000e+00> : vector<9x128xf32>
    %43 = tpu.matmul %41, %42, %cst_32 {dimension_numbers = #tpu.dot_dimension_numbers<[1], [0], [0], [1], [0, 0, 1, 1], [], []>} : vector<9x128xbf16>, vector<128x128xbf16>, vector<9x128xf32> -> vector<9x128xf32>
    %c0_33 = arith.constant 0 : index
    %c0_34 = arith.constant 0 : index
    %44 = vector.load %arg14[%c0_33, %c0_34] : memref<9x1xf32, #tpu.memory_space<vmem>>, vector<9x1xf32>
    %45 = vector.broadcast %44 : vector<9x1xf32> to vector<9x128xf32>
    %46 = arith.addf %43, %45 : vector<9x128xf32>
    %c0_35 = arith.constant 0 : index
    %c0_36 = arith.constant 0 : index
    %47 = vector.load %arg15[%c0_35, %c0_36] : memref<9x128xf32, #tpu.memory_space<vmem>>, vector<9x128xf32>
    tpu.vector_store %arg15[%c0_35, %c0_36], %46 {strides = array<i32>} : memref<9x128xf32, #tpu.memory_space<vmem>>, vector<9x128xf32>,
    %c128_i32 = arith.constant 128 : i32
    %48 = arith.muli %arg0, %c128_i32 : i32
    %49 = tpu.iota {dimensions = array<i32: 1>} : vector<1x128xi32>
    %50 = vector.broadcast %48 : i32 to vector<1x128xi32>
    %51 = arith.addi %50, %49 : vector<1x128xi32>
    %c0_37 = arith.constant 0 : index
    %52 = memref.load %arg1[%c0_37] : memref<1xi32, #tpu.memory_space<smem>>
    %53 = vector.broadcast %52 : i32 to vector<1x128xi32>
    %54 = arith.cmpi slt, %51, %53 : vector<1x128xi32>
    %cst_38 = arith.constant -1.000000e+30 : f32
    %55 = vector.shape_cast %54 : vector<1x128xi1> to vector<1x128xi1>
    %56 = vector.broadcast %55 : vector<1x128xi1> to vector<9x128xi1>
    %57 = vector.broadcast %cst_38 : f32 to vector<9x128xf32>
    %58 = arith.select %56, %46, %57 : vector<9x128xi1>, vector<9x128xf32>
    %cst_39 = arith.constant dense<0xFF800000> : vector<9xf32>
    %59 = vector.multi_reduction <maximumf>, %58, %cst_39 [1] : vector<9x128xf32> to vector<9xf32>
    %60 = vector.shape_cast %59 : vector<9xf32> to vector<9x1xf32>
    %61 = vector.broadcast %60 : vector<9x1xf32> to vector<9x128xf32>
    %62 = arith.subf %46, %61 : vector<9x128xf32>
    %cst_40 = arith.constant 0.000000e+00 : f32
    %63 = vector.broadcast %cst_40 : f32 to vector<9x128xf32>
    %64 = arith.minimumf %62, %63 : vector<9x128xf32>
    %65 = math.exp %64 : vector<9x128xf32>
    %cst_41 = arith.constant 0.000000e+00 : f32
    %66 = vector.shape_cast %54 : vector<1x128xi1> to vector<1x128xi1>
    %67 = vector.broadcast %66 : vector<1x128xi1> to vector<9x128xi1>
    %68 = vector.broadcast %cst_41 : f32 to vector<9x128xf32>
    %69 = arith.select %67, %65, %68 : vector<9x128xi1>, vector<9x128xf32>
    %cst_42 = arith.constant dense<0.000000e+00> : vector<9xf32>
    %70 = vector.multi_reduction <add>, %69, %cst_42 [1] : vector<9x128xf32> to vector<9xf32>
    %71 = vector.shape_cast %70 : vector<9xf32> to vector<9x1xf32>
    %72 = tpu.iota {dimensions = array<i32: 1>} : vector<9x128xi32>
    %73 = vector.shape_cast %60 : vector<9x1xf32> to vector<9x1xf32>
    %74 = vector.broadcast %73 : vector<9x1xf32> to vector<9x128xf32>
    %c0_43 = arith.constant 0 : index
    %c0_44 = arith.constant 0 : index
    %75 = vector.load %arg16[%c0_43, %c0_44] : memref<9x128xf32, #tpu.memory_space<vmem>>, vector<9x128xf32>
    tpu.vector_store %arg16[%c0_43, %c0_44], %74 {strides = array<i32>} : memref<9x128xf32, #tpu.memory_space<vmem>>, vector<9x128xf32>,
    %c0_i32 = arith.constant 0 : i32
    %76 = vector.broadcast %c0_i32 : i32 to vector<9x128xi32>
    %77 = arith.cmpi eq, %72, %76 : vector<9x128xi32>
    %cst_45 = arith.constant 0.000000e+00 : f32
    %78 = vector.shape_cast %71 : vector<9x1xf32> to vector<9x1xf32>
    %79 = vector.broadcast %78 : vector<9x1xf32> to vector<9x128xf32>
    %80 = vector.broadcast %cst_45 : f32 to vector<9x128xf32>
    %81 = arith.select %77, %79, %80 : vector<9x128xi1>, vector<9x128xf32>
    %c0_46 = arith.constant 0 : index
    %c0_47 = arith.constant 0 : index
    %82 = vector.load %arg17[%c0_46, %c0_47] : memref<9x128xf32, #tpu.memory_space<vmem>>, vector<9x128xf32>
    tpu.vector_store %arg17[%c0_46, %c0_47], %81 {strides = array<i32>} : memref<9x128xf32, #tpu.memory_space<vmem>>, vector<9x128xf32>,
    return
  }
  func.func @transform_0(%arg0: i32, %arg1: memref<1xi32, #tpu.memory_space<smem>>) -> (i32, i32) {
    %c0_i32 = arith.constant 0 : i32
    %c0_i32_0 = arith.constant 0 : i32
    return %c0_i32, %arg0 : i32, i32
  }
  func.func @transform_1(%arg0: i32, %arg1: memref<1xi32, #tpu.memory_space<smem>>) -> (i32, i32) {
    %c0_i32 = arith.constant 0 : i32
    %c0_i32_0 = arith.constant 0 : i32
    %c0_i32_1 = arith.constant 0 : i32
    return %c0_i32, %c0_i32_0 : i32, i32
  }
  func.func @transform_2(%arg0: i32, %arg1: memref<1xi32, #tpu.memory_space<smem>>) -> (i32, i32) {
    %c0_i32 = arith.constant 0 : i32
    %c0_i32_0 = arith.constant 0 : i32
    %c0_i32_1 = arith.constant 0 : i32
    return %c0_i32, %c0_i32_0 : i32, i32
  }
  func.func @transform_3(%arg0: i32, %arg1: memref<1xi32, #tpu.memory_space<smem>>) -> (i32, i32) {
    %c0_i32 = arith.constant 0 : i32
    %c0_i32_0 = arith.constant 0 : i32
    %c0_i32_1 = arith.constant 0 : i32
    return %c0_i32, %c0_i32_0 : i32, i32
  }
  func.func @transform_4(%arg0: i32, %arg1: memref<1xi32, #tpu.memory_space<smem>>) -> (i32, i32) {
    %c0_i32 = arith.constant 0 : i32
    %c0_i32_0 = arith.constant 0 : i32
    %c0_i32_1 = arith.constant 0 : i32
    return %c0_i32, %c0_i32_0 : i32, i32
  }
  func.func @transform_5(%arg0: i32, %arg1: memref<1xi32, #tpu.memory_space<smem>>) -> (i32, i32) {
    %c0_i32 = arith.constant 0 : i32
    %c0_i32_0 = arith.constant 0 : i32
    %c0_i32_1 = arith.constant 0 : i32
    return %c0_i32, %c0_i32_0 : i32, i32
  }
  func.func @transform_6(%arg0: i32, %arg1: memref<1xi32, #tpu.memory_space<smem>>) -> (i32, i32) {
    %c0_i32 = arith.constant 0 : i32
    %c0_i32_0 = arith.constant 0 : i32
    %c0_i32_1 = arith.constant 0 : i32
    return %c0_i32, %c0_i32_0 : i32, i32
  }
  func.func @transform_7(%arg0: i32, %arg1: memref<1xi32, #tpu.memory_space<smem>>) -> (i32, i32) {
    %c0_i32 = arith.constant 0 : i32
    %c0_i32_0 = arith.constant 0 : i32
    %c0_i32_1 = arith.constant 0 : i32
    return %c0_i32, %c0_i32_0 : i32, i32
  }
  func.func @transform_8(%arg0: i32, %arg1: memref<1xi32, #tpu.memory_space<smem>>) -> (i32, i32) {
    %c0_i32 = arith.constant 0 : i32
    %c0_i32_0 = arith.constant 0 : i32
    %c0_i32_1 = arith.constant 0 : i32
    return %c0_i32, %c0_i32_0 : i32, i32
  }
  func.func @transform_9(%arg0: i32, %arg1: memref<1xi32, #tpu.memory_space<smem>>) -> (i32, i32) {
    %c0_i32 = arith.constant 0 : i32
    %c0_i32_0 = arith.constant 0 : i32
    %c0_i32_1 = arith.constant 0 : i32
    return %c0_i32, %c0_i32_0 : i32, i32
  }
  func.func @transform_10(%arg0: i32, %arg1: memref<1xi32, #tpu.memory_space<smem>>) -> (i32, i32) {
    %c0_i32 = arith.constant 0 : i32
    %c0_i32_0 = arith.constant 0 : i32
    %c0_i32_1 = arith.constant 0 : i32
    return %c0_i32, %c0_i32_0 : i32, i32
  }
  func.func @transform_11(%arg0: i32, %arg1: memref<1xi32, #tpu.memory_space<smem>>) -> (i32, i32) {
    %c0_i32 = arith.constant 0 : i32
    %c0_i32_0 = arith.constant 0 : i32
    %c0_i32_1 = arith.constant 0 : i32
    return %c0_i32, %c0_i32_0 : i32, i32
  }
  func.func @transform_12(%arg0: i32, %arg1: memref<1xi32, #tpu.memory_space<smem>>) -> (i32, i32) {
    %c0_i32 = arith.constant 0 : i32
    %c0_i32_0 = arith.constant 0 : i32
    %c0_i32_1 = arith.constant 0 : i32
    return %c0_i32, %c0_i32_0 : i32, i32
  }
  func.func @transform_13(%arg0: i32, %arg1: memref<1xi32, #tpu.memory_space<smem>>) -> (i32, i32) {
    %c0_i32 = arith.constant 0 : i32
    %c0_i32_0 = arith.constant 0 : i32
    return %c0_i32, %arg0 : i32, i32
  }
  func.func @transform_14(%arg0: i32, %arg1: memref<1xi32, #tpu.memory_space<smem>>) -> (i32, i32) {
    %c0_i32 = arith.constant 0 : i32
    %c0_i32_0 = arith.constant 0 : i32
    return %c0_i32, %arg0 : i32, i32
  }
  func.func @transform_15(%arg0: i32, %arg1: memref<1xi32, #tpu.memory_space<smem>>) -> (i32, i32) {
    %c0_i32 = arith.constant 0 : i32
    %c0_i32_0 = arith.constant 0 : i32
    return %c0_i32, %arg0 : i32, i32
  }
}

</mosaic_0001>

<bundles_post_ra>
// kernel: tpu_custom_call.1
= control target key start
LH: loop header
LB: loop body
LE: loop exit
PB: predicated region body
PF: predicated region fallthrough
CT: control target
= control target key end

     0   :  { %s1805_s0 = inlined_call_operand.<no memory space> [shape: s32[1], index: 0, kind: input, shape index: {}]   ;;  %s1806_s1 = inlined_call_operand.vmem [shape: f32[4,128], index: 1, kind: input, shape index: {}]   ;;  %s1807_s2 = inlined_call_operand.vmem [shape: bf16[16,4], index: 2, kind: input, shape index: {}]   ;;  %s1808_s3 = inlined_call_operand.vmem [shape: f32[16,1], index: 3, kind: input, shape index: {}]   ;;  %s1809_s4 = inlined_call_operand.vmem [shape: bf16[32,16], index: 4, kind: input, shape index: {}]   ;;  %s1810_s5 = inlined_call_operand.vmem [shape: f32[32,1], index: 5, kind: input, shape index: {}]   ;;  %s1811_s6 = inlined_call_operand.vmem [shape: bf16[64,32], index: 6, kind: input, shape index: {}]   ;;  %s1812_s7 = inlined_call_operand.vmem [shape: f32[64,1], index: 7, kind: input, shape index: {}]   ;;  %s1813_s8 = inlined_call_operand.vmem [shape: bf16[128,64], index: 8, kind: input, shape index: {}]   ;;  %s1814_s9 = inlined_call_operand.vmem [shape: f32[128,1], index: 9, kind: input, shape index: {}]   ;;  %s1815_s10 = inlined_call_operand.vmem [shape: bf16[128,128], index: 10, kind: input, shape index: {}]   ;;  %s1816_s11 = inlined_call_operand.vmem [shape: f32[128,1], index: 11, kind: input, shape index: {}]   ;;  %s1817_s12 = inlined_call_operand.vmem [shape: bf16[9,128], index: 12, kind: input, shape index: {}]   ;;  %s1818_s13 = inlined_call_operand.vmem [shape: f32[9,1], index: 13, kind: input, shape index: {}]   ;;  %s1819_s14 = inlined_call_operand.hbm [shape: f32[9,128], index: 14, kind: output, shape index: {0}]   ;;  %s1820_s15 = inlined_call_operand.hbm [shape: f32[9,128], index: 15, kind: output, shape index: {1}]   ;;  %s1821_s16 = inlined_call_operand.hbm [shape: f32[9,128], index: 16, kind: output, shape index: {2}]  }
   0x1   :  { %1822 = sst [smem:[#allocation11_spill]] %s1805_s0 }
   0x2   :  { %23 = vsyncpa [#allocation5], 0  ;;  %v56_v0 = vld [vmem:[%s1808_s3] sm:$0xff]  ;;  %vm77_vm0 = vcmask 1041408   ;;  %v1409_v2 = vmov 0   ;;  %v1410_v3 = vmov 0.0  }
   0x3   :  { %v52_v1 = vld [vmem:[%s1806_s1] sm:$0xf]  ;;  %1315 = vset.pattern.permute.xlu0 %v1409_v2  ;;  %1207 = vmatprep.subr.bf16.mxu0 %v1410_v3  ;;  %vm1411_vm1 = vmmov 0   ;;  %v57_v6 = vld [vmem:[%s1808_s3 + $0x8] sm:$0xff]  ;;  %vm73_vm2 = vcmask 31744   ;;  %v239_v9 = vld [vmem:[%s1812_s7 + $0x30] sm:$0xff] }
   0x4   :  { %v55_v4 = vpack.c.bf16 %v52_v1, %v52_v1  ;;  %60 = vperm.xlu0 %1315, %v56_v0   ;;  %1209 = vmatprep.mubr.msk.bf16.mxu0 %vm1411_vm1, %v1410_v3  ;;  %v1317_v7 = vld [vmem:[%s1807_s2] sm:$0xff]   ;;  %v235_v11 = vld [vmem:[%s1812_s7 + $0x10] sm:$0xff] }
   0x5   :  { %1316 = vset.pattern.permute.xlu1 %v1409_v2  ;;  %v129_v8 = vld [vmem:[%s1810_s5] sm:$0xff] }
   0x6   :  { %v79_v5 = vsel %vm77_vm0, %v55_v4, 0  ;;  %v237_v10 = vld [vmem:[%s1812_s7 + $0x20] sm:$0xff] }
   0x7   :  { %1208 = vmatpush3.bf16.msra.mxu0 %v79_v5  ;;  %v233_v12 = vld [vmem:[%s1812_s7] sm:$0xff] }
   0x8   :  { %65 = vperm.xlu0 %1315, %v57_v6  }
   0xa   :  { %1210 = vmatmul.mubr.msk.bf16.vlgmr.msra.gmra.mxu0 %vm73_vm2, %v1317_v7 }
   0xc   :  { %135 = vperm.xlu0 %1315, %v129_v8  }
  0x10   :  { %273 = vperm.xlu0 %1315, %v239_v9  }
  0x14   :  { %263 = vperm.xlu0 %1315, %v237_v10  }
  0x18   :  { %253 = vperm.xlu0 %1315, %v235_v11  }
  0x19   :  { %24 = vsyncpa [#allocation7], 0  ;;  %v421_v13 = vld [vmem:[%s1814_s9 + $0x70] sm:$0xff]  ;;  %v419_v14 = vld [vmem:[%s1814_s9 + $0x60] sm:$0xff]  ;;  %vm163_vm3 = vcmask 130048   ;;  %vm301_vm4 = vcmask 261120  }
  0x1a   :  { %v417_v15 = vld [vmem:[%s1814_s9 + $0x50] sm:$0xff]  ;;  %v415_v16 = vld [vmem:[%s1814_s9 + $0x40] sm:$0xff]  ;;  %v132_v24 = vld [vmem:[%s1810_s5 + $0x18] sm:$0xff]  ;;  %vm543_vm5 = vcmask 523264   ;;  %s1823_s21 = sld [smem:[#allocation11_spill]]  ;;  %vm1047_vm7 = vcmask 1040384  }
  0x1b   :  { %v413_v17 = vld [vmem:[%s1814_s9 + $0x30] sm:$0xff]  ;;  %v411_v18 = vld [vmem:[%s1814_s9 + $0x20] sm:$0xff]  ;;  %v130_v26 = vld [vmem:[%s1810_s5 + $0x8] sm:$0xff]  ;;  %s1413_s23 = smov [#allocation4]  }
  0x1c   :  { %243 = vperm.xlu0 %1315, %v233_v12   ;;  %v409_v19 = vld [vmem:[%s1814_s9 + $0x10] sm:$0xff]  ;;  %v407_v20 = vld [vmem:[%s1814_s9] sm:$0xff]  ;;  %v240_v28 = vld [vmem:[%s1812_s7 + $0x38] sm:$0xff]  ;;  %s1078_s24 = sshll.u32 %s1413_s23, 4  ;;  %s1079_s24 = int_to_ptr.vmem [resolvable:$true] %s1078_s24 }
  0x1d   :  { %v719_v21 = vld [vmem:[%s1816_s11 + $0x70] sm:$0xff]  ;;  %v717_v23 = vld [vmem:[%s1816_s11 + $0x60] sm:$0xff]  ;;  %v238_v30 = vld [vmem:[%s1812_s7 + $0x28] sm:$0xff] }
  0x1e   :  { %v131_v22 = vld [vmem:[%s1810_s5 + $0x10] sm:$0xff]  ;;  %v713_v27 = vld [vmem:[%s1816_s11 + $0x40] sm:$0xff]  ;;  %v236_v32 = vld [vmem:[%s1812_s7 + $0x18] sm:$0xff] }
  0x1f   :  { %145 = vperm.xlu1 %1316, %v131_v22   ;;  %v715_v25 = vld [vmem:[%s1816_s11 + $0x50] sm:$0xff]  ;;  %v709_v31 = vld [vmem:[%s1816_s11 + $0x20] sm:$0xff]  ;;  %v234_v35 = vld [vmem:[%s1812_s7 + $0x8] sm:$0xff] }
  0x20   :  { %495 = vperm.xlu0 %1315, %v421_v13   ;;  %v711_v29 = vld [vmem:[%s1816_s11 + $0x30] sm:$0xff]  ;;  %v1318_v34 = vld [vmem:[%s1809_s4] sm:$0xff]   ;;  %v422_v37 = vld [vmem:[%s1814_s9 + $0x78] sm:$0xff] }
  0x21   :  { %v707_v33 = vld [vmem:[%s1816_s11 + $0x10] sm:$0xff]  ;;  %1215 = vmatprep.mubr.msk.bf16.mxu1 %vm163_vm3, %v1318_v34  ;;  %v705_v36 = vld [vmem:[%s1816_s11] sm:$0xff]  ;;  %v973_v38 = vld [vmem:[%s1818_s13 + $0x8] sm:$0x1] }
  0x22   :  { %v420_v39 = vld [vmem:[%s1814_s9 + $0x68] sm:$0xff]  ;;  %v418_v40 = vld [vmem:[%s1814_s9 + $0x58] sm:$0xff]  ;;  %v972_v54 = vld [vmem:[%s1818_s13] sm:$0xff] }
  0x23   :  { %150 = vperm.xlu1 %1316, %v132_v24   ;;  %v416_v41 = vld [vmem:[%s1814_s9 + $0x48] sm:$0xff]  ;;  %v414_v42 = vld [vmem:[%s1814_s9 + $0x38] sm:$0xff]  ;;  %v1320_v4 = vld [vmem:[%s1811_s6] sm:$0xff]  }
  0x24   :  { %485 = vperm.xlu0 %1315, %v419_v14   ;;  %v412_v43 = vld [vmem:[%s1814_s9 + $0x28] sm:$0xff]  ;;  %v410_v44 = vld [vmem:[%s1814_s9 + $0x18] sm:$0xff]  ;;  %v1322_v24 = vld [vmem:[%s1811_s6 + $0x10] sm:$0xff]  }
  0x25   :  { %v408_v45 = vld [vmem:[%s1814_s9 + $0x8] sm:$0xff]  ;;  %v720_v46 = vld [vmem:[%s1816_s11 + $0x78] sm:$0xff] }
  0x26   :  { %v718_v47 = vld [vmem:[%s1816_s11 + $0x68] sm:$0xff]  ;;  %v716_v48 = vld [vmem:[%s1816_s11 + $0x58] sm:$0xff] }
  0x27   :  { %140 = vperm.xlu1 %1316, %v130_v26   ;;  %v714_v49 = vld [vmem:[%s1816_s11 + $0x48] sm:$0xff]  ;;  %v712_v50 = vld [vmem:[%s1816_s11 + $0x38] sm:$0xff]  ;;  %v1324_v26 = vld [vmem:[%s1813_s8] sm:$0xff]  }
  0x28   :  { %475 = vperm.xlu0 %1315, %v417_v15   ;;  %v710_v51 = vld [vmem:[%s1816_s11 + $0x28] sm:$0xff]  ;;  %v708_v52 = vld [vmem:[%s1816_s11 + $0x18] sm:$0xff] }
  0x29   :  { %v706_v53 = vld [vmem:[%s1816_s11 + $0x8] sm:$0xff] }
  0x2a   :  { %v1319_v2 = vld [vmem:[%s1809_s4 + $0x8] sm:$0xff]  }
  0x2b   :  { %278 = vperm.xlu1 %1316, %v240_v28  }
  0x2c   :  { %465 = vperm.xlu0 %1315, %v415_v16  }
  0x2f   :  { %268 = vperm.xlu1 %1316, %v238_v30  }
  0x30   :  { %455 = vperm.xlu0 %1315, %v413_v17  }
  0x33   :  { %258 = vperm.xlu1 %1316, %v236_v32  }
  0x34   :  { %445 = vperm.xlu0 %1315, %v411_v18  }
  0x37   :  { %248 = vperm.xlu1 %1316, %v234_v35  }
  0x38   :  { %435 = vperm.xlu0 %1315, %v409_v19  }
  0x3b   :  { %500 = vperm.xlu1 %1316, %v422_v37  }
  0x3c   :  { %425 = vperm.xlu0 %1315, %v407_v20  }
  0x3f   :  { %490 = vperm.xlu1 %1316, %v420_v39  }
  0x40   :  { %793 = vperm.xlu0 %1315, %v719_v21  }
  0x43   :  { %480 = vperm.xlu1 %1316, %v418_v40  }
  0x44   :  { %783 = vperm.xlu0 %1315, %v717_v23   ;;  %v1321_v23 = vld [vmem:[%s1811_s6 + $0x8] sm:$0xff]  }
  0x47   :  { %470 = vperm.xlu1 %1316, %v416_v41  }
  0x48   :  { %773 = vperm.xlu0 %1315, %v715_v25   ;;  %v1323_v25 = vld [vmem:[%s1811_s6 + $0x18] sm:$0xff]  }
  0x4b   :  { %460 = vperm.xlu1 %1316, %v414_v42  }
  0x4c   :  { %763 = vperm.xlu0 %1315, %v713_v27  }
  0x4f   :  { %450 = vperm.xlu1 %1316, %v412_v43  }
  0x50   :  { %753 = vperm.xlu0 %1315, %v711_v29  }
  0x53   :  { %440 = vperm.xlu1 %1316, %v410_v44  }
  0x54   :  { %743 = vperm.xlu0 %1315, %v709_v31  }
  0x57   :  { %430 = vperm.xlu1 %1316, %v408_v45  }
  0x58   :  { %733 = vperm.xlu0 %1315, %v707_v33  }
  0x5b   :  { %798 = vperm.xlu1 %1316, %v720_v46  }
  0x5c   :  { %723 = vperm.xlu0 %1315, %v705_v36  }
  0x5f   :  { %788 = vperm.xlu1 %1316, %v718_v47  }
  0x60   :  { %981 = vperm.xlu0 %1315, %v973_v38  }
  0x63   :  { %778 = vperm.xlu1 %1316, %v716_v48  }
  0x67   :  { %768 = vperm.xlu1 %1316, %v714_v49  }
  0x6b   :  { %758 = vperm.xlu1 %1316, %v712_v50  }
  0x6f   :  { %748 = vperm.xlu1 %1316, %v710_v51  }
  0x73   :  { %738 = vperm.xlu1 %1316, %v708_v52  }
  0x77   :  { %728 = vperm.xlu1 %1316, %v706_v53  }
  0x7b   :  { %976 = vperm.xlu1 %1316, %v972_v54  }
  0x7f   :  { %v61_v55 = vpop.permute.xlu0 %60 }
  0x83   :  { %v66_v59 = vpop.permute.xlu0 %65 }
  0x87   :  { %v136_v10 = vpop.permute.xlu0 %135 }
  0x8b   :  { %v274_v29 = vpop.permute.xlu0 %273 }
  0x8f   :  { %v264_v34 = vpop.permute.xlu0 %263 }
  0x93   :  { %v254_v42 = vpop.permute.xlu0 %253 }
  0x9a   :  { %v146_v5 = vpop.permute.xlu1 %145 }
  0x9e   :  { %v151_v6 = vpop.permute.xlu1 %150 }
  0xa2   :  { %v141_v14 = vpop.permute.xlu1 %140 }
  0xa6   :  { %v279_v27 = vpop.permute.xlu1 %278 }
  0xaa   :  { %v269_v32 = vpop.permute.xlu1 %268 }
  0xae   :  { %v259_v38 = vpop.permute.xlu1 %258 }
  0xb2   :  { %v249_v52 = vpop.permute.xlu1 %248 }
  0xca   :  { %v115_v56 = vpop.f32.mrf.mxu0 }
  0xcb   :  { %v116_v58 = vadd.f32 %v115_v56, %v61_v55  ;;  %v244_v56 = vpop.permute.xlu0 %243 }
  0xcc   :  { %v1211_v57 = vpop.f32.mrf.mxu0 }
  0xcd   :  { %v122_v63 = vmax.f32 %v116_v58, 0.0 }
  0xce   :  { %v118_v60 = vpop.f32.mrf.mxu0 }
  0xcf   :  { %v119_v61 = vadd.f32 %v118_v60, %v66_v59 }
  0xd0   :  { %v1212_v62 = vpop.f32.mrf.mxu0 }
  0xd1   :  { %v123_v0 = vmax.f32 %v119_v61, 0.0 }
  0xd3   :  { %v128_v1 = vpack.c.bf16 %v123_v0, %v122_v63  ;;  %v1325_v63 = vld [vmem:[%s1813_s8 + $0x8] sm:$0xff]   ;;  %v1326_v0 = vld [vmem:[%s1813_s8 + $0x10] sm:$0xff]  }
  0xd5   :  { %1213 = vmatprep.subr.bf16.mxu1 %v128_v1 }
  0xd6   :  { %1214 = vmatpush3.bf16.msra.mxu1 %v128_v1  ;;  %v1327_v1 = vld [vmem:[%s1813_s8 + $0x18] sm:$0xff]  }
  0xd9   :  { %1216 = vmatmul.mubr.msk.bf16.vlgmr.msra.gmra.mxu1 %vm163_vm3, %v1319_v2  ;;  %v1328_v2 = vld [vmem:[%s1813_s8 + $0x20] sm:$0xff]  }
  0xda   :  { %1223 = vmatprep.mubr.msk.bf16.mxu1 %vm301_vm4, %v1320_v4  ;;  %v1329_v4 = vld [vmem:[%s1813_s8 + $0x28] sm:$0xff]  }
 0x199   :  { %v1217_v7 = vpop.f32.mrf.mxu1 }
 0x19a   :  { %v213_v9 = vadd.f32 %v1217_v7, %v146_v5  ;;  %v1330_v5 = vld [vmem:[%s1813_s8 + $0x30] sm:$0xff]   ;;  %v1332_v7 = vld [vmem:[%s1815_s10] sm:$0xff]  }
 0x19b   :  { %v204_v8 = vpop.f32.mrf.mxu1  ;;  %1271 = vmatprep.mubr.bf16.mxu0 %v1332_v7 }
 0x19c   :  { %v205_v12 = vadd.f32 %v204_v8, %v136_v10  ;;  %v221_v16 = vmax.f32 %v213_v9, 0.0 }
 0x19d   :  { %v1218_v11 = vpop.f32.mrf.mxu1 }
 0x19e   :  { %v216_v13 = vadd.f32 %v1218_v11, %v151_v6  ;;  %v219_v19 = vmax.f32 %v205_v12, 0.0  ;;  %v1331_v6 = vld [vmem:[%s1813_s8 + $0x38] sm:$0xff]   ;;  %v501_v12 = vpop.permute.xlu1 %500 }
 0x19f   :  { %v207_v15 = vpop.f32.mrf.mxu1 }
 0x1a0   :  { %v222_v17 = vmax.f32 %v216_v13, 0.0  ;;  %v208_v18 = vadd.f32 %v207_v15, %v141_v14  ;;  %v496_v14 = vpop.permute.xlu0 %495 }
 0x1a2   :  { %v232_v20 = vpack.c.bf16 %v222_v17, %v221_v16  ;;  %v220_v21 = vmax.f32 %v208_v18, 0.0  ;;  %v491_v17 = vpop.permute.xlu1 %490 }
 0x1a4   :  { %v231_v22 = vpack.c.bf16 %v220_v21, %v219_v19  ;;  %1219 = vmatprep.subr.bf16.mxu1 %v232_v20  ;;  %v486_v19 = vpop.permute.xlu0 %485 }
 0x1a5   :  { %1220 = vmatpush3.bf16.msra.mxu1 %v232_v20 }
 0x1a6   :  { %1221 = vmatprep.subr.bf16.mxu1 %v231_v22 }
 0x1a9   :  { %1222 = vmatpush3.bf16.msra.mxu1 %v231_v22  ;;  %v481_v22 = vpop.permute.xlu1 %480 }
 0x1ac   :  { %1224 = vmatmul.mubr.msk.bf16.vlgmr.msra.gmra.mxu1 %vm301_vm4, %v1321_v23 }
 0x1ad   :  { %1227 = vmatprep.mubr.msk.bf16.mxu1 %vm301_vm4, %v1322_v24  ;;  %v476_v24 = vpop.permute.xlu0 %475 }
 0x1b4   :  { %1228 = vmatmul.mubr.msk.bf16.gmra.mxu1 %vm301_vm4, %v1323_v25 }
 0x1b5   :  { %1239 = vmatprep.mubr.msk.bf16.mxu1 %vm543_vm5, %v1324_v26 }
 0x26c   :  { %v1225_v28 = vpop.f32.mrf.mxu1 }
 0x26d   :  { %v357_v48 = vadd.f32 %v1225_v28, %v254_v42 }
 0x26e   :  { %v348_v30 = vpop.f32.mrf.mxu1 }
 0x26f   :  { %v381_v57 = vmax.f32 %v357_v48, 0.0  ;;  %v349_v58 = vadd.f32 %v348_v30, %v244_v56  ;;  %v466_v30 = vpop.permute.xlu0 %465 }
 0x270   :  { %v1226_v31 = vpop.f32.mrf.mxu1 }
 0x271   :  { %v360_v44 = vadd.f32 %v1226_v31, %v259_v38  ;;  %v379_v61 = vmax.f32 %v349_v58, 0.0 }
 0x272   :  { %v351_v33 = vpop.f32.mrf.mxu1 }
 0x273   :  { %v382_v53 = vmax.f32 %v360_v44, 0.0  ;;  %v352_v54 = vadd.f32 %v351_v33, %v249_v52  ;;  %v456_v44 = vpop.permute.xlu0 %455 }
 0x274   :  { %v1229_v35 = vpop.f32.mrf.mxu1 }
 0x275   :  { %v373_v37 = vadd.f32 %v1229_v35, %v274_v29  ;;  %v404_v59 = vpack.c.bf16 %v382_v53, %v381_v57  ;;  %v380_v60 = vmax.f32 %v352_v54, 0.0 }
 0x276   :  { %v364_v36 = vpop.f32.mrf.mxu1 }
 0x277   :  { %v365_v40 = vadd.f32 %v364_v36, %v264_v34  ;;  %v385_v45 = vmax.f32 %v373_v37, 0.0  ;;  %v403_v62 = vpack.c.bf16 %v380_v60, %v379_v61  ;;  %v446_v54 = vpop.permute.xlu0 %445 }
 0x278   :  { %v1230_v39 = vpop.f32.mrf.mxu1 }
 0x279   :  { %v376_v41 = vadd.f32 %v1230_v39, %v279_v27  ;;  %v383_v49 = vmax.f32 %v365_v40, 0.0  ;;  %v471_v27 = vpop.permute.xlu1 %470 }
 0x27a   :  { %v367_v43 = vpop.f32.mrf.mxu1 }
 0x27b   :  { %v386_v46 = vmax.f32 %v376_v41, 0.0  ;;  %v368_v47 = vadd.f32 %v367_v43, %v269_v32 }
 0x27d   :  { %v406_v50 = vpack.c.bf16 %v386_v46, %v385_v45  ;;  %v384_v51 = vmax.f32 %v368_v47, 0.0  ;;  %v461_v39 = vpop.permute.xlu1 %460 }
 0x27f   :  { %v405_v55 = vpack.c.bf16 %v384_v51, %v383_v49  ;;  %1231 = vmatprep.subr.bf16.mxu1 %v406_v50 }
 0x280   :  { %1232 = vmatpush3.bf16.msra.mxu1 %v406_v50 }
 0x281   :  { %1233 = vmatprep.subr.bf16.mxu1 %v405_v55  ;;  %v451_v50 = vpop.permute.xlu1 %450 }
 0x284   :  { %1234 = vmatpush3.bf16.msra.mxu1 %v405_v55 }
 0x285   :  { %1235 = vmatprep.subr.bf16.mxu1 %v404_v59  ;;  %v441_v60 = vpop.permute.xlu1 %440 }
 0x288   :  { %1236 = vmatpush3.bf16.msra.mxu1 %v404_v59 }
 0x289   :  { %1237 = vmatprep.subr.bf16.mxu1 %v403_v62 }
 0x28c   :  { %1238 = vmatpush3.bf16.msra.mxu1 %v403_v62 }
 0x28d   :  { %1287 = vmatprep.subr.bf16.mxu1 %v1410_v3 }
 0x28f   :  { %1240 = vmatmul.mubr.msk.bf16.vlgmr.msra.gmra.mxu1 %vm543_vm5, %v1325_v63  ;;  %v436_v63 = vpop.permute.xlu0 %435 }
 0x290   :  { %1243 = vmatprep.mubr.msk.bf16.mxu1 %vm543_vm5, %v1326_v0 }
 0x297   :  { %1244 = vmatmul.mubr.msk.bf16.gmra.mxu1 %vm543_vm5, %v1327_v1 }
 0x298   :  { %1247 = vmatprep.mubr.msk.bf16.mxu1 %vm543_vm5, %v1328_v2 }
 0x29f   :  { %1248 = vmatmul.mubr.msk.bf16.gmra.mxu1 %vm543_vm5, %v1329_v4 }
 0x2a0   :  { %1251 = vmatprep.mubr.msk.bf16.mxu1 %vm543_vm5, %v1330_v5 }
 0x2a7   :  { %1252 = vmatmul.mubr.msk.bf16.gmra.mxu1 %vm543_vm5, %v1331_v6  ;;  %v431_v6 = vpop.permute.xlu1 %430 }
 0x2a8   :  { %1303 = vmatprep.mubr.msk.bf16.mxu1 %vm1411_vm1, %v1410_v3 }
 0x34f   :  { %v1717_v8 = vpop.f32.mrf.mxu1 }
 0x350   :  { %v611_v4 = vadd.f32 %v1717_v8, %v436_v63  ;;  %v1333_v8 = vld [vmem:[%s1815_s10 + $0x8] sm:$0xff]  }
 0x351   :  { %v1719_v9 = vpop.f32.mrf.mxu1 }
 0x353   :  { %v1242_v10 = vpop.f32.mrf.mxu1 }
 0x354   :  { %v614_v0 = vadd.f32 %v1242_v10, %v441_v60 }
 0x355   :  { %v1721_v11 = vpop.f32.mrf.mxu1 }
 0x356   :  { %v668_v7 = vmax.f32 %v614_v0, 0.0 }
 0x357   :  { %v1245_v13 = vpop.f32.mrf.mxu1 }
 0x358   :  { %v627_v55 = vadd.f32 %v1245_v13, %v456_v44 }
 0x359   :  { %v618_v15 = vpop.f32.mrf.mxu1 }
 0x35a   :  { %v671_v61 = vmax.f32 %v627_v55, 0.0  ;;  %v619_v62 = vadd.f32 %v618_v15, %v446_v54 }
 0x35b   :  { %v1246_v16 = vpop.f32.mrf.mxu1 }
 0x35c   :  { %v630_v51 = vadd.f32 %v1246_v16, %v461_v39  ;;  %v669_v5 = vmax.f32 %v619_v62, 0.0  ;;  %v667_v16 = vmax.f32 %v611_v4, 0.0 }
 0x35d   :  { %v621_v18 = vpop.f32.mrf.mxu1 }
 0x35e   :  { %v672_v57 = vmax.f32 %v630_v51, 0.0  ;;  %v622_v58 = vadd.f32 %v621_v18, %v451_v50 }
 0x35f   :  { %v1249_v20 = vpop.f32.mrf.mxu1 }
 0x360   :  { %v643_v40 = vadd.f32 %v1249_v20, %v476_v24  ;;  %v700_v1 = vpack.c.bf16 %v672_v57, %v671_v61  ;;  %v670_v2 = vmax.f32 %v622_v58, 0.0  ;;  %v1336_v20 = vld [vmem:[%s1815_s10 + $0x20] sm:$0xff]  }
 0x361   :  { %v634_v21 = vpop.f32.mrf.mxu1 }
 0x362   :  { %v675_v48 = vmax.f32 %v643_v40, 0.0  ;;  %v635_v49 = vadd.f32 %v634_v21, %v466_v30  ;;  %v699_v13 = vpack.c.bf16 %v670_v2, %v669_v5  ;;  %v1337_v21 = vld [vmem:[%s1815_s10 + $0x28] sm:$0xff]  }
 0x363   :  { %v1250_v23 = vpop.f32.mrf.mxu1 }
 0x364   :  { %v646_v35 = vadd.f32 %v1250_v23, %v481_v22  ;;  %v673_v56 = vmax.f32 %v635_v49, 0.0  ;;  %v1338_v22 = vld [vmem:[%s1815_s10 + $0x30] sm:$0xff]   ;;  %v1339_v23 = vld [vmem:[%s1815_s10 + $0x38] sm:$0xff]  }
 0x365   :  { %v637_v25 = vpop.f32.mrf.mxu1 }
 0x366   :  { %v676_v45 = vmax.f32 %v646_v35, 0.0  ;;  %v638_v46 = vadd.f32 %v637_v25, %v471_v27 }
 0x367   :  { %v1253_v26 = vpop.f32.mrf.mxu1 }
 0x368   :  { %v659_v29 = vadd.f32 %v1253_v26, %v496_v14  ;;  %v702_v52 = vpack.c.bf16 %v676_v45, %v675_v48  ;;  %v674_v53 = vmax.f32 %v638_v46, 0.0  ;;  %v426_v14 = vpop.permute.xlu0 %425 }
 0x369   :  { %v650_v28 = vpop.f32.mrf.mxu1  ;;  %v603_v15 = vadd.f32 %v1719_v9, %v426_v14  ;;  %v1335_v9 = vld [vmem:[%s1815_s10 + $0x18] sm:$0xff]  }
 0x36a   :  { %v651_v32 = vadd.f32 %v650_v28, %v486_v19  ;;  %v679_v36 = vmax.f32 %v659_v29, 0.0  ;;  %v701_v59 = vpack.c.bf16 %v674_v53, %v673_v56  ;;  %v799_v29 = vpop.permute.xlu1 %798 }
 0x36b   :  { %v1254_v31 = vpop.f32.mrf.mxu1  ;;  %v665_v18 = vmax.f32 %v603_v15, 0.0 }
 0x36c   :  { %v662_v33 = vadd.f32 %v1254_v31, %v501_v12  ;;  %v677_v41 = vmax.f32 %v651_v32, 0.0  ;;  %v606_v12 = vadd.f32 %v1721_v11, %v431_v6  ;;  %v1334_v11 = vld [vmem:[%s1815_s10 + $0x10] sm:$0xff]   ;;  %v794_v31 = vpop.permute.xlu0 %793 }
 0x36d   :  { %v653_v34 = vpop.f32.mrf.mxu1 }
 0x36e   :  { %v680_v37 = vmax.f32 %v662_v33, 0.0  ;;  %v654_v38 = vadd.f32 %v653_v34, %v491_v17  ;;  %v698_v17 = vpack.c.bf16 %v668_v7, %v667_v16  ;;  %v666_v10 = vmax.f32 %v606_v12, 0.0  ;;  %v789_v34 = vpop.permute.xlu1 %788 }
 0x370   :  { %v704_v42 = vpack.c.bf16 %v680_v37, %v679_v36  ;;  %v678_v43 = vmax.f32 %v654_v38, 0.0  ;;  %v697_v19 = vpack.c.bf16 %v666_v10, %v665_v18  ;;  %v784_v36 = vpop.permute.xlu0 %783 }
 0x372   :  { %v703_v47 = vpack.c.bf16 %v678_v43, %v677_v41  ;;  %1255 = vmatprep.subr.bf16.mxu0 %v704_v42  ;;  %v779_v39 = vpop.permute.xlu1 %778 }
 0x373   :  { %1256 = vmatpush3.bf16.msra.mxu0 %v704_v42 }
 0x374   :  { %1257 = vmatprep.subr.bf16.mxu0 %v703_v47  ;;  %v774_v41 = vpop.permute.xlu0 %773 }
 0x376   :  { %v769_v45 = vpop.permute.xlu1 %768 }
 0x377   :  { %1258 = vmatpush3.bf16.msra.mxu0 %v703_v47 }
 0x378   :  { %1259 = vmatprep.subr.bf16.mxu0 %v702_v52  ;;  %v764_v48 = vpop.permute.xlu0 %763 }
 0x37a   :  { %v759_v57 = vpop.permute.xlu1 %758 }
 0x37b   :  { %1260 = vmatpush3.bf16.msra.mxu0 %v702_v52 }
 0x37c   :  { %1261 = vmatprep.subr.bf16.mxu0 %v701_v59  ;;  %v754_v60 = vpop.permute.xlu0 %753 }
 0x37e   :  { %v749_v2 = vpop.permute.xlu1 %748 }
 0x37f   :  { %1262 = vmatpush3.bf16.msra.mxu0 %v701_v59 }
 0x380   :  { %1263 = vmatprep.subr.bf16.mxu0 %v700_v1  ;;  %v744_v7 = vpop.permute.xlu0 %743 }
 0x383   :  { %1264 = vmatpush3.bf16.msra.mxu0 %v700_v1 }
 0x384   :  { %1265 = vmatprep.subr.bf16.mxu0 %v699_v13 }
 0x387   :  { %1266 = vmatpush3.bf16.msra.mxu0 %v699_v13 }
 0x388   :  { %1267 = vmatprep.subr.bf16.mxu0 %v698_v17 }
 0x38b   :  { %1268 = vmatpush3.bf16.msra.mxu0 %v698_v17  ;;  %v739_v17 = vpop.permute.xlu1 %738 }
 0x38c   :  { %1269 = vmatprep.subr.bf16.mxu0 %v697_v19 }
 0x38f   :  { %1270 = vmatpush3.bf16.msra.mxu0 %v697_v19  ;;  %v734_v19 = vpop.permute.xlu0 %733 }
 0x392   :  { %1272 = vmatmul.mubr.bf16.vlgmr.msra.gmra.mxu0 %v1333_v8 }
 0x393   :  { %1275 = vmatprep.mubr.bf16.mxu0 %v1334_v11 }
 0x39a   :  { %1276 = vmatmul.mubr.bf16.gmra.mxu0 %v1335_v9 }
 0x39b   :  { %1279 = vmatprep.mubr.bf16.mxu0 %v1336_v20 }
 0x3a2   :  { %1280 = vmatmul.mubr.bf16.gmra.mxu0 %v1337_v21 }
 0x3a3   :  { %1283 = vmatprep.mubr.bf16.mxu0 %v1338_v22  ;;  %v729_v22 = vpop.permute.xlu1 %728 }
 0x3aa   :  { %1284 = vmatmul.mubr.bf16.gmra.mxu0 %v1339_v23 }
 0x452   :  { %v1747_v24 = vpop.f32.mrf.mxu0 }
 0x453   :  { %v892_v20 = vadd.f32 %v1747_v24, %v734_v19 }
 0x454   :  { %v1749_v25 = vpop.f32.mrf.mxu0 }
 0x456   :  { %v1274_v26 = vpop.f32.mrf.mxu0 }
 0x457   :  { %v895_v8 = vadd.f32 %v1274_v26, %v739_v17 }
 0x458   :  { %v1751_v27 = vpop.f32.mrf.mxu0 }
 0x459   :  { %v949_v23 = vmax.f32 %v895_v8, 0.0 }
 0x45a   :  { %v1277_v28 = vpop.f32.mrf.mxu0 }
 0x45b   :  { %v908_v12 = vadd.f32 %v1277_v28, %v754_v60  ;;  %v887_v28 = vadd.f32 %v1751_v27, %v729_v22  ;;  %v1034_v27 = vlaneseq }
 0x45c   :  { %v899_v30 = vpop.f32.mrf.mxu0 }
 0x45d   :  { %v952_v10 = vmax.f32 %v908_v12, 0.0  ;;  %v900_v18 = vadd.f32 %v899_v30, %v744_v7  ;;  %v948_v30 = vmax.f32 %v892_v20, 0.0 }
 0x45e   :  { %v1278_v32 = vpop.f32.mrf.mxu0 }
 0x45f   :  { %v911_v4 = vadd.f32 %v1278_v32, %v759_v57  ;;  %v950_v21 = vmax.f32 %v900_v18, 0.0  ;;  %v965_v26 = vpack.c.bf16 %v949_v23, %v948_v30 }
 0x460   :  { %v902_v33 = vpop.f32.mrf.mxu0 }
 0x461   :  { %v953_v14 = vmax.f32 %v911_v4, 0.0  ;;  %v903_v16 = vadd.f32 %v902_v33, %v749_v2  ;;  %v947_v33 = vmax.f32 %v887_v28, 0.0 }
 0x462   :  { %v1281_v35 = vpop.f32.mrf.mxu0 }
 0x463   :  { %v924_v58 = vadd.f32 %v1281_v35, %v774_v41  ;;  %v967_v11 = vpack.c.bf16 %v953_v14, %v952_v10  ;;  %v951_v9 = vmax.f32 %v903_v16, 0.0  ;;  %v1340_v35 = vld [vmem:[%s1817_s12] sm:$0x1f]   ;;  %s1412_s12 = smov [#allocation6]  }
 0x464   :  { %v915_v37 = vpop.f32.mrf.mxu0  ;;  %s1090_s22 = sshll.u32 %s1412_s12, 4  ;;  %s1091_s22 = int_to_ptr.vmem [resolvable:$true] %s1090_s22 }
 0x465   :  { %v956_v0 = vmax.f32 %v924_v58, 0.0  ;;  %v916_v1 = vadd.f32 %v915_v37, %v764_v48  ;;  %v977_v37 = vpop.permute.xlu1 %976  ;;  %s1345_s25 = scalar_lea.vmem %s1091_s22, 256  ;;  %p1350_p1 = scmp.lt.s32.totalorder %s1091_s22, %s1091_s22 }
 0x466   :  { %v1282_v38 = vpop.f32.mrf.mxu0  ;;  %p1346_p0 = scmp.ne.s32.totalorder %s1091_s22, %s1345_s25  ;;  %p1351_p2 = scmp.lt.s32.totalorder %s1345_s25, %s1345_s25 }
 0x467   :  { %v927_v54 = vadd.f32 %v1282_v38, %v779_v39  ;;  %v954_v13 = vmax.f32 %v916_v1, 0.0 }
 0x468   :  { %v918_v40 = vpop.f32.mrf.mxu0  ;;  %p1352_p3 = por %p1351_p2, %p1350_p1 }
 0x469   :  { %v957_v61 = vmax.f32 %v927_v54, 0.0  ;;  %v919_v62 = vadd.f32 %v918_v40, %v769_v45 }
 0x46a   :  { %v1285_v42 = vpop.f32.mrf.mxu0  ;;  %p1353_p4 = pnand %p1352_p3, %p1346_p0 }
 0x46b   :  { %v940_v44 = vadd.f32 %v1285_v42, %v794_v31  ;;  %v969_v5 = vpack.c.bf16 %v957_v61, %v956_v0  ;;  %v955_v6 = vmax.f32 %v919_v62, 0.0  ;;  %v724_v31 = vpop.permute.xlu0 %723 }
 0x46c   :  { %v931_v43 = vpop.f32.mrf.mxu0  ;;  %v884_v32 = vadd.f32 %v1749_v25, %v724_v31  ;;  %v1039_v25 = vstv %s1823_s21 }
 0x46d   :  { %v960_v50 = vmax.f32 %v940_v44, 0.0  ;;  %v932_v51 = vadd.f32 %v931_v43, %v784_v36  ;;  %v968_v15 = vpack.c.bf16 %v955_v6, %v954_v13  ;;  %v1766_v36 = vand.u32 127, %v1034_v27 }
 0x46e   :  { %v1286_v46 = vpop.f32.mrf.mxu0 }
 0x46f   :  { %v943_v47 = vadd.f32 %v1286_v46, %v799_v29  ;;  %v958_v59 = vmax.f32 %v932_v51, 0.0  ;;  %v966_v29 = vpack.c.bf16 %v951_v9, %v950_v21  ;;  %vm1772_vm6 = vcmp.lt.s32.totalorder %v1766_v36, %v1039_v25  ;;  %v982_v42 = vpop.permute.xlu0 %981 }
 0x470   :  { %v934_v49 = vpop.f32.mrf.mxu0 }
 0x471   :  { %v961_v52 = vmax.f32 %v943_v47, 0.0  ;;  %v935_v53 = vadd.f32 %v934_v49, %v789_v34  ;;  %v946_v34 = vmax.f32 %v884_v32, 0.0 }
 0x473   :  { %v971_v55 = vpack.c.bf16 %v961_v52, %v960_v50  ;;  %v959_v56 = vmax.f32 %v935_v53, 0.0  ;;  %v964_v24 = vpack.c.bf16 %v947_v33, %v946_v34 }
 0x475   :  { %1288 = vmatpush3.bf16.msra.mxu1 %v971_v55  ;;  %v970_v63 = vpack.c.bf16 %v959_v56, %v958_v59 }
 0x476   :  { %1289 = vmatprep.subr.bf16.mxu1 %v1410_v3 }
 0x479   :  { %1290 = vmatpush3.bf16.msra.mxu1 %v970_v63 }
 0x47a   :  { %1291 = vmatprep.subr.bf16.mxu1 %v1410_v3 }
 0x47d   :  { %1292 = vmatpush3.bf16.msra.mxu1 %v969_v5 }
 0x47e   :  { %1293 = vmatprep.subr.bf16.mxu1 %v1410_v3 }
 0x481   :  { %1294 = vmatpush3.bf16.msra.mxu1 %v968_v15 }
 0x482   :  { %1295 = vmatprep.subr.bf16.mxu1 %v1410_v3 }
 0x485   :  { %1296 = vmatpush3.bf16.msra.mxu1 %v967_v11 }
 0x486   :  { %1297 = vmatprep.subr.bf16.mxu1 %v1410_v3 }
 0x489   :  { %1298 = vmatpush3.bf16.msra.mxu1 %v966_v29 }
 0x48a   :  { %1299 = vmatprep.subr.bf16.mxu1 %v1410_v3 }
 0x48d   :  { %1300 = vmatpush3.bf16.msra.mxu1 %v965_v26 }
 0x48e   :  { %1301 = vmatprep.subr.bf16.mxu1 %v1410_v3 }
 0x491   :  { %1302 = vmatpush3.bf16.msra.mxu1 %v964_v24 }
 0x494   :  { %1304 = vmatmul.mubr.bf16.vlgmr.msra.gmra.mxu1 %v1340_v35 }
 0x554   :  { %v1024_v38 = vpop.f32.mrf.mxu1 }
 0x555   :  { %v1025_v3 = vadd.f32 %v1024_v38, %v977_v37 }
 0x556   :  { %v1305_v40 = vpop.f32.mrf.mxu1 }
 0x557   :  { %1031 = vst [vmem:[#allocation4] sm:$0xff] %v1025_v3  ;;  %v1043_v41 = vsel %vm1772_vm6, %v1025_v3, -1e+30 }
 0x558   :  { %1045 = vmax.xlane.f32.xlu1 %v1043_v41  ;;  %v1027_v43 = vpop.f32.mrf.mxu1 }
 0x559   :  { %v1028_v44 = vadd.f32 %v1027_v43, %v982_v42 }
 0x55a   :  { %v1306_v45 = vpop.f32.mrf.mxu1 }
 0x55b   :  { %1032 = vst [vmem:[#allocation4 + $0x8] sm:$0x1] %v1028_v44  ;;  %v1044_v46 = vsel %vm1772_vm6, %v1028_v44, -1e+30 }
 0x55c   :  { %v1048_v47 = vsel %vm1047_vm7, %v1044_v46, -inf }
 0x55d   :  { %1049 = vmax.xlane.f32.xlu0 %v1048_v47 }
 0x5e1   :  { %v1046_v48 = vpop.xlane.xlu1 %1045 }
 0x5e2   :  { %v1051_v49 = vsub.f32 %v1025_v3, %v1046_v48  ;;  %1066 = vst [vmem:[#allocation6] sm:$0xff] %v1046_v48 }
 0x5e4   :  { %v1053_v50 = vmin.f32 %v1051_v49, 0.0 }
 0x5e6   :  { %v1055_v51 = vmul.f32 1.442695, %v1053_v50  ;;  %v1050_v52 = vpop.xlane.xlu0 %1049 }
 0x5e7   :  { %v1052_v53 = vsub.f32 %v1028_v44, %v1050_v52  ;;  %1067 = vst [vmem:[#allocation6 + $0x8] sm:$0x1] %v1050_v52 }
 0x5e8   :  { %1341 = vpow2.f32 %v1055_v51 }
 0x5e9   :  { %v1054_v54 = vmin.f32 %v1052_v53, 0.0 }
 0x5eb   :  { %v1057_v55 = vmul.f32 1.442695, %v1054_v54 }
 0x5ed   :  { %1343 = vpow2.f32 %v1057_v55 }
 0x5f5   :  { %v1342_v56 = vpop.eup %1341 }
 0x5f6   :  { %v1059_v57 = vsel %vm1772_vm6, %v1342_v56, 0.0 }
 0x5f7   :  { %1061 = vadd.xlane.f32.xlu0 %v1059_v57 }
 0x5fa   :  { %v1344_v58 = vpop.eup %1343 }
 0x5fb   :  { %v1060_v59 = vsel %vm1772_vm6, %v1344_v58, 0.0 }
 0x5fc   :  { %v1063_v60 = vsel %vm1047_vm7, %v1060_v59, 0.0 }
 0x5fd   :  { %1064 = vadd.xlane.f32.xlu0 %v1063_v60 }
 0x5fe   :  { %1356 = shalt.err (!%p1353_p4)
}
 0x5ff   :  { %s1414_s26 = smov 128   ;;  %s1415_s27 = smov 8  }
 0x600   :  { %1096 = dma.vmem_to_hbm [thread:$0]  %s1091_s22, 256, %s1820_s15, [#allocation7], %s1414_s26, %s1414_s26, %s1415_s27  }
 0x601   :  { %s1365_s8 = scalar_lea.vmem %s1079_s24, 256  ;;  %p1370_p6 = scmp.lt.s32.totalorder %s1079_s24, %s1079_s24 }
 0x602   :  { %p1366_p5 = scmp.ne.s32.totalorder %s1079_s24, %s1365_s8  ;;  %p1371_p7 = scmp.lt.s32.totalorder %s1365_s8, %s1365_s8 }
 0x604   :  { %p1372_p8 = por %p1371_p7, %p1370_p6 }
 0x606   :  { %p1373_p9 = pnand %p1372_p8, %p1366_p5 }
 0x608   :  { %1376 = shalt.err (!%p1373_p9)
}
 0x609   :  { %1084 = dma.vmem_to_hbm [thread:$0]  %s1079_s24, 256, %s1819_s14, [#allocation5], %s1414_s26, %s1414_s26, %s1415_s27   ;;  %vm1068_vm8 = vcmp.eq.s32.totalorder %v1766_v36, 0 }
 0x60a   :  { %s1416_s15 = smov [#allocation8]  }
 0x60b   :  { %s1102_s1 = sshll.u32 %s1416_s15, 4  ;;  %s1103_s1 = int_to_ptr.vmem [resolvable:$true] %s1102_s1 }
 0x60c   :  { %s1385_s29 = scalar_lea.vmem %s1103_s1, 256  ;;  %p1390_p11 = scmp.lt.s32.totalorder %s1103_s1, %s1103_s1 }
 0x60d   :  { %p1386_p10 = scmp.ne.s32.totalorder %s1103_s1, %s1385_s29  ;;  %p1391_p12 = scmp.lt.s32.totalorder %s1385_s29, %s1385_s29 }
 0x60f   :  { %p1392_p13 = por %p1391_p12, %p1390_p11 }
 0x611   :  { %p1393_p0 = pnand %p1392_p13, %p1386_p10 }
 0x680   :  { %v1062_v61 = vpop.xlane.xlu0 %1061 }
 0x681   :  { %v1069_v62 = vsel %vm1068_vm8, %v1062_v61, 0.0 }
 0x682   :  { %1071 = vst [vmem:[#allocation8] sm:$0xff] %v1069_v62 }
 0x686   :  { %v1065_v63 = vpop.xlane.xlu0 %1064 }
 0x687   :  { %v1070_v0 = vsel %vm1068_vm8, %v1065_v63, 0.0 }
 0x688   :  { %1072 = vst [vmem:[#allocation8 + $0x8] sm:$0x1] %v1070_v0 }
 0x689   :  { %1396 = shalt.err (!%p1393_p0)
}
 0x68a   :  { %1108 = dma.vmem_to_hbm [thread:$0]  %s1103_s1, 256, %s1821_s16, [#allocation7], %s1414_s26, %s1414_s26, %s1415_s27  }
 0x68b   :  { %1405 = dma.done.wait [#allocation5], 256  }
 0x68c   :  { %1406 = vsyncadd [#allocation5], 4294967040 }
 0x68d   :  { %1407 = dma.done.wait [#allocation7], 512  }
 0x68e   :  { %1408 = vsyncadd [#allocation7], 4294966784 }
 0x68f   :  { %1118 = vsyncpa [#allocation5], 1 }
 0x690   :  { %1119 = vsyncpa [#allocation7], 1 }

</bundles_post_ra>
